<compile_context>
chip_gen: v5e
topology: v5e:2x2
jax: 0.10.0
libtpu: 0.0.40
codegen_flags: <defaults>
</compile_context>

<pallas_src>
from itertools import product

import numpy as np
import jax
import jax.numpy as jnp
from jax.experimental import pallas as pl
from jax.experimental.pallas import tpu as pltpu

INF = 100000000.0


def fcos_encode_kernel(meta_ref, bb_ref, lab_ref, reg_ref, cls_ref, cnt_ref):
    meta = meta_ref[...]                       # (4, TP) lane-dense
    xs = meta[0:1, :]                          # (1, TP)
    ys = meta[1:2, :]
    ls = meta[2:3, :]
    us = meta[3:4, :]

    bb = bb_ref[...]                           # (N_pad, 4)
    x0 = bb[:, 0:1]                            # (N_pad, 1) -> broadcast over lanes
    y0 = bb[:, 1:2]
    x1 = bb[:, 2:3]
    y1 = bb[:, 3:4]

    # distances of every point to every box side: (N_pad,1) x (1,TP) -> (N_pad, TP)
    left = xs - x0
    top = ys - y0
    right = x1 - xs
    bottom = y1 - ys

    areas = (left + right) * (top + bottom)
    dmin = jnp.minimum(jnp.minimum(left, top), jnp.minimum(right, bottom))
    dmax = jnp.maximum(jnp.maximum(left, top), jnp.maximum(right, bottom))

    # single fused validity mask / single select (perf review)
    valid = jnp.logical_and(dmin > 0.0,
                            jnp.logical_and(ls <= dmax, dmax <= us))
    areas = jnp.where(valid, areas, INF)

    n = areas.shape[0]                                            # N_pad
    min_area = jnp.min(areas, axis=0, keepdims=True)              # (1, TP)
    iota = jax.lax.broadcasted_iota(jnp.int32, areas.shape, 0)    # (N_pad, TP)
    # first index achieving the min (matches torch .min(dim=1) tie-break)
    idx_min = jnp.min(jnp.where(areas == min_area, iota, n), axis=0, keepdims=True)
    sel = iota == idx_min                                         # one-hot over N

    zf = jnp.zeros_like(left)
    reg_l = jnp.sum(jnp.where(sel, left, zf), axis=0, keepdims=True)    # (1, TP)
    reg_t = jnp.sum(jnp.where(sel, top, zf), axis=0, keepdims=True)
    reg_r = jnp.sum(jnp.where(sel, right, zf), axis=0, keepdims=True)
    reg_b = jnp.sum(jnp.where(sel, bottom, zf), axis=0, keepdims=True)

    # lane-dense, unmasked row stores (no lane-axis concatenate)
    reg_ref[0:1, :] = reg_l
    reg_ref[1:2, :] = reg_t
    reg_ref[2:3, :] = reg_r
    reg_ref[3:4, :] = reg_b

    lab = lab_ref[...]                                                  # (N_pad, 1) i32
    cls_sel = jnp.sum(jnp.where(sel, lab, 0), axis=0, keepdims=True)    # (1, TP)
    cls_ref[...] = jnp.where(min_area == INF, 0, cls_sel)

    # centerness: sqrt( min(l,t)/max(l,t) * min(r,b)/max(r,b) ), one divide
    num = jnp.minimum(reg_l, reg_t) * jnp.minimum(reg_r, reg_b)
    den = jnp.maximum(reg_l, reg_t) * jnp.maximum(reg_r, reg_b)
    cnt_ref[...] = jnp.sqrt(num / den)


def build_points(input_size, feat_levels):
    """Deterministic buffers from FCOSEncoder.__init__ (host-side precompute)."""
    H, W = input_size
    strides = [2 ** i for i in feat_levels]
    regress_ranges = [[s * 4, s * 8] for s in strides]
    regress_ranges[0][0] = -1
    regress_ranges[-1][-1] = INF
    all_points, all_rr = [], []
    for stride, rr in zip(strides, regress_ranges):
        pts = [[x, y] for y, x in product(range(stride // 2, H, stride),
                                          range(stride // 2, W, stride))]
        all_points.extend(pts)
        all_rr.extend([rr] * len(pts))
    return (jnp.asarray(all_points, dtype=jnp.float32),
            jnp.asarray(all_rr, dtype=jnp.float32))


def fcos_encoder(all_points, all_regress_ranges, bboxes, labels, tp=256):
    """Forward pass of FCOSEncoder via the Pallas kernel."""
    P = all_points.shape[0]
    N = bboxes.shape[0]
    P_pad = ((P + tp - 1) // tp) * tp
    N_pad = ((N + 7) // 8) * 8

    # (4, P_pad): points on lanes
    meta = jnp.concatenate([all_points, all_regress_ranges], axis=1).astype(jnp.float32)
    meta = jnp.pad(meta, ((0, P_pad - P), (0, 0))).T

    # (N_pad, 4): boxes on sublanes; padded boxes are degenerate [0,0,-1,-1]
    # so right = -1 - x <= -1 < 0  =>  always invalid, can never win the argmin.
    pad_box = jnp.array([[0.0, 0.0, -1.0, -1.0]], dtype=jnp.float32)
    bb = jnp.concatenate(
        [bboxes.astype(jnp.float32),
         jnp.tile(pad_box, (N_pad - N, 1))], axis=0)
    lab = jnp.concatenate(
        [labels.astype(jnp.int32),
         jnp.zeros((N_pad - N,), jnp.int32)], axis=0).reshape(N_pad, 1)

    reg, cls, cnt = pl.pallas_call(
        fcos_encode_kernel,
        out_shape=(
            jax.ShapeDtypeStruct((4, P_pad), jnp.float32),
            jax.ShapeDtypeStruct((1, P_pad), jnp.int32),
            jax.ShapeDtypeStruct((1, P_pad), jnp.float32),
        ),
        grid=(P_pad // tp,),
        in_specs=[
            pl.BlockSpec((4, tp), lambda i: (0, i)),
            pl.BlockSpec((N_pad, 4), lambda i: (0, 0)),
            pl.BlockSpec((N_pad, 1), lambda i: (0, 0)),
        ],
        out_specs=(
            pl.BlockSpec((4, tp), lambda i: (0, i)),
            pl.BlockSpec((1, tp), lambda i: (0, i)),
            pl.BlockSpec((1, tp), lambda i: (0, i)),
        ),
        compiler_params=pltpu.CompilerParams(dimension_semantics=("parallel",)),
    )(meta, bb, lab)

    # back to the torch module's output layout; strip point padding
    return reg.T[:P], cls[0, :P], cnt.T[:P]


def fcos_encoder_ref(points, rr, bboxes, labels):
    """Pure-JAX reference mirroring the torch forward."""
    xs = points[:, 0:1]
    ys = points[:, 1:2]
    ls = rr[:, 0:1]
    us = rr[:, 1:2]
    left = xs - bboxes[:, 0]
    top = ys - bboxes[:, 1]
    right = bboxes[:, 2] - xs
    bottom = bboxes[:, 3] - ys
    distances = jnp.stack([left, top, right, bottom], axis=-1)
    areas = (left + right) * (top + bottom)
    inside_bboxes = distances.min(axis=-1) > 0
    dmax = distances.max(axis=-1)
    inside_ranges = jnp.logical_and(ls <= dmax, dmax <= us)
    areas = jnp.where(inside_bboxes, areas, INF)
    areas = jnp.where(inside_ranges, areas, INF)
    min_area = areas.min(axis=1)
    inds = jnp.argmin(areas, axis=1)
    cls_t = labels[inds]
    cls_t = jnp.where(min_area == INF, 0, cls_t)
    reg_t = distances[jnp.arange(points.shape[0]), inds]
    ratios = (jnp.minimum(reg_t[:, [0, 2]], reg_t[:, [1, 3]])
              / jnp.maximum(reg_t[:, [0, 2]], reg_t[:, [1, 3]]))
    cnt_t = jnp.sqrt(jnp.prod(ratios, axis=-1, keepdims=True))
    return reg_t, cls_t, cnt_t


if __name__ == "__main__":
    key = jax.random.PRNGKey(0)
    input_size = [16, 16]
    feat_levels = [2, 3]          # strides 4, 8  ->  16 + 4 = 20 points
    all_points, all_rr = build_points(input_size, feat_levels)

    N = 8
    k1, k2, k3 = jax.random.split(key, 3)
    xy0 = jax.random.uniform(k1, (N, 2), minval=0.0, maxval=10.0)
    wh = jax.random.uniform(k2, (N, 2), minval=2.0, maxval=8.0)
    bboxes = jnp.concatenate([xy0, jnp.minimum(xy0 + wh, 16.0)], axis=1)   # (N, 4)
    labels = jax.random.randint(k3, (N,), 1, 6, dtype=jnp.int32)           # (N,)

    reg, cls, cnt = fcos_encoder(all_points, all_rr, bboxes, labels)
    jax.block_until_ready((reg, cls, cnt))

    reg_r, cls_r, cnt_r = fcos_encoder_ref(all_points, all_rr, bboxes, labels)
    np.testing.assert_allclose(np.asarray(reg), np.asarray(reg_r), rtol=1e-6, atol=1e-6)
    np.testing.assert_array_equal(np.asarray(cls), np.asarray(cls_r))
    np.testing.assert_allclose(np.asarray(cnt), np.asarray(cnt_r),
                               rtol=1e-6, atol=1e-6, equal_nan=True)
    print("KERNEL_OK")
</pallas_src>

<mosaic_0001>
module attributes {stable_mosaic.version = 11 : i64} {
  func.func @fcos_encode_kernel(%arg0: i32, %arg1: memref<4x256xf32, #tpu.memory_space<vmem>>, %arg2: memref<8x4xf32, #tpu.memory_space<vmem>>, %arg3: memref<8x1xi32, #tpu.memory_space<vmem>>, %arg4: memref<4x256xf32, #tpu.memory_space<vmem>>, %arg5: memref<1x256xi32, #tpu.memory_space<vmem>>, %arg6: memref<1x256xf32, #tpu.memory_space<vmem>>) attributes {dimension_semantics = [#tpu.dimension_semantics<parallel>], iteration_bounds = array<i64: 1>, scalar_prefetch = 0 : i64, scratch_operands = 0 : i64, tpu.core_type = #tpu.core_type<tc>, window_params = [{transform_indices = @transform_0, window_bounds = array<i64: 4, 256>}, {pipeline_mode = #tpu.pipeline_mode<synchronous>, transform_indices = @transform_1, window_bounds = array<i64: 8, 4>}, {pipeline_mode = #tpu.pipeline_mode<synchronous>, transform_indices = @transform_2, window_bounds = array<i64: 8, 1>}, {transform_indices = @transform_3, window_bounds = array<i64: 4, 256>}, {transform_indices = @transform_4, window_bounds = array<i64: 1, 256>}, {transform_indices = @transform_5, window_bounds = array<i64: 1, 256>}]} {
    %c0 = arith.constant 0 : index
    %c0_0 = arith.constant 0 : index
    %0 = vector.load %arg1[%c0, %c0_0] : memref<4x256xf32, #tpu.memory_space<vmem>>, vector<4x256xf32>
    %1 = vector.extract_strided_slice %0 {offsets = [0, 0], sizes = [1, 256], strides = [1, 1]} : vector<4x256xf32> to vector<1x256xf32>
    %2 = vector.extract_strided_slice %0 {offsets = [1, 0], sizes = [1, 256], strides = [1, 1]} : vector<4x256xf32> to vector<1x256xf32>
    %3 = vector.extract_strided_slice %0 {offsets = [2, 0], sizes = [1, 256], strides = [1, 1]} : vector<4x256xf32> to vector<1x256xf32>
    %4 = vector.extract_strided_slice %0 {offsets = [3, 0], sizes = [1, 256], strides = [1, 1]} : vector<4x256xf32> to vector<1x256xf32>
    %c0_1 = arith.constant 0 : index
    %c0_2 = arith.constant 0 : index
    %5 = vector.load %arg2[%c0_1, %c0_2] : memref<8x4xf32, #tpu.memory_space<vmem>>, vector<8x4xf32>
    %6 = vector.extract_strided_slice %5 {offsets = [0, 0], sizes = [8, 1], strides = [1, 1]} : vector<8x4xf32> to vector<8x1xf32>
    %7 = vector.extract_strided_slice %5 {offsets = [0, 1], sizes = [8, 1], strides = [1, 1]} : vector<8x4xf32> to vector<8x1xf32>
    %8 = vector.extract_strided_slice %5 {offsets = [0, 2], sizes = [8, 1], strides = [1, 1]} : vector<8x4xf32> to vector<8x1xf32>
    %9 = vector.extract_strided_slice %5 {offsets = [0, 3], sizes = [8, 1], strides = [1, 1]} : vector<8x4xf32> to vector<8x1xf32>
    %10 = vector.broadcast %1 : vector<1x256xf32> to vector<8x256xf32>
    %11 = vector.broadcast %6 : vector<8x1xf32> to vector<8x256xf32>
    %12 = arith.subf %10, %11 : vector<8x256xf32>
    %13 = vector.broadcast %2 : vector<1x256xf32> to vector<8x256xf32>
    %14 = vector.broadcast %7 : vector<8x1xf32> to vector<8x256xf32>
    %15 = arith.subf %13, %14 : vector<8x256xf32>
    %16 = vector.broadcast %8 : vector<8x1xf32> to vector<8x256xf32>
    %17 = vector.broadcast %1 : vector<1x256xf32> to vector<8x256xf32>
    %18 = arith.subf %16, %17 : vector<8x256xf32>
    %19 = vector.broadcast %9 : vector<8x1xf32> to vector<8x256xf32>
    %20 = vector.broadcast %2 : vector<1x256xf32> to vector<8x256xf32>
    %21 = arith.subf %19, %20 : vector<8x256xf32>
    %22 = arith.addf %12, %18 : vector<8x256xf32>
    %23 = arith.addf %15, %21 : vector<8x256xf32>
    %24 = arith.mulf %22, %23 : vector<8x256xf32>
    %25 = arith.minimumf %12, %15 : vector<8x256xf32>
    %26 = arith.minimumf %18, %21 : vector<8x256xf32>
    %27 = arith.minimumf %25, %26 : vector<8x256xf32>
    %28 = arith.maximumf %12, %15 : vector<8x256xf32>
    %29 = arith.maximumf %18, %21 : vector<8x256xf32>
    %30 = arith.maximumf %28, %29 : vector<8x256xf32>
    %cst = arith.constant 0.000000e+00 : f32
    %31 = vector.broadcast %cst : f32 to vector<8x256xf32>
    %32 = arith.cmpf ogt, %27, %31 : vector<8x256xf32>
    %33 = vector.broadcast %3 : vector<1x256xf32> to vector<8x256xf32>
    %34 = arith.cmpf ole, %33, %30 : vector<8x256xf32>
    %35 = vector.broadcast %4 : vector<1x256xf32> to vector<8x256xf32>
    %36 = arith.cmpf ole, %30, %35 : vector<8x256xf32>
    %37 = arith.andi %34, %36 : vector<8x256xi1>
    %38 = arith.andi %32, %37 : vector<8x256xi1>
    %cst_3 = arith.constant 1.000000e+08 : f32
    %39 = vector.broadcast %cst_3 : f32 to vector<8x256xf32>
    %40 = arith.select %38, %24, %39 : vector<8x256xi1>, vector<8x256xf32>
    %cst_4 = arith.constant dense<0x7F800000> : vector<256xf32>
    %41 = vector.multi_reduction <minimumf>, %40, %cst_4 [0] : vector<8x256xf32> to vector<256xf32>
    %42 = vector.shape_cast %41 : vector<256xf32> to vector<1x256xf32>
    %43 = tpu.iota {dimensions = array<i32: 0>} : vector<8x256xi32>
    %44 = vector.broadcast %42 : vector<1x256xf32> to vector<8x256xf32>
    %45 = arith.cmpf oeq, %40, %44 : vector<8x256xf32>
    %c8_i32 = arith.constant 8 : i32
    %46 = vector.broadcast %c8_i32 : i32 to vector<8x256xi32>
    %47 = arith.select %45, %43, %46 : vector<8x256xi1>, vector<8x256xi32>
    %cst_5 = arith.constant dense<2147483647> : vector<256xi32>
    %48 = vector.multi_reduction <minsi>, %47, %cst_5 [0] : vector<8x256xi32> to vector<256xi32>
    %49 = vector.shape_cast %48 : vector<256xi32> to vector<1x256xi32>
    %50 = vector.broadcast %49 : vector<1x256xi32> to vector<8x256xi32>
    %51 = arith.cmpi eq, %43, %50 : vector<8x256xi32>
    %cst_6 = arith.constant 0.000000e+00 : f32
    %52 = vector.broadcast %cst_6 : f32 to vector<8x256xf32>
    %53 = arith.select %51, %12, %52 : vector<8x256xi1>, vector<8x256xf32>
    %cst_7 = arith.constant dense<0.000000e+00> : vector<256xf32>
    %54 = vector.multi_reduction <add>, %53, %cst_7 [0] : vector<8x256xf32> to vector<256xf32>
    %55 = vector.shape_cast %54 : vector<256xf32> to vector<1x256xf32>
    %56 = arith.select %51, %15, %52 : vector<8x256xi1>, vector<8x256xf32>
    %cst_8 = arith.constant dense<0.000000e+00> : vector<256xf32>
    %57 = vector.multi_reduction <add>, %56, %cst_8 [0] : vector<8x256xf32> to vector<256xf32>
    %58 = vector.shape_cast %57 : vector<256xf32> to vector<1x256xf32>
    %59 = arith.select %51, %18, %52 : vector<8x256xi1>, vector<8x256xf32>
    %cst_9 = arith.constant dense<0.000000e+00> : vector<256xf32>
    %60 = vector.multi_reduction <add>, %59, %cst_9 [0] : vector<8x256xf32> to vector<256xf32>
    %61 = vector.shape_cast %60 : vector<256xf32> to vector<1x256xf32>
    %62 = arith.select %51, %21, %52 : vector<8x256xi1>, vector<8x256xf32>
    %cst_10 = arith.constant dense<0.000000e+00> : vector<256xf32>
    %63 = vector.multi_reduction <add>, %62, %cst_10 [0] : vector<8x256xf32> to vector<256xf32>
    %64 = vector.shape_cast %63 : vector<256xf32> to vector<1x256xf32>
    %c0_11 = arith.constant 0 : index
    %c0_12 = arith.constant 0 : index
    %65 = vector.load %arg4[%c0_11, %c0_12] : memref<4x256xf32, #tpu.memory_space<vmem>>, vector<1x256xf32>
    tpu.vector_store %arg4[%c0_11, %c0_12], %55 {strides = array<i32>} : memref<4x256xf32, #tpu.memory_space<vmem>>, vector<1x256xf32>,
    %c1 = arith.constant 1 : index
    %c0_13 = arith.constant 0 : index
    %66 = vector.load %arg4[%c1, %c0_13] : memref<4x256xf32, #tpu.memory_space<vmem>>, vector<1x256xf32>
    tpu.vector_store %arg4[%c1, %c0_13], %58 {strides = array<i32>} : memref<4x256xf32, #tpu.memory_space<vmem>>, vector<1x256xf32>,
    %c2 = arith.constant 2 : index
    %c0_14 = arith.constant 0 : index
    %67 = vector.load %arg4[%c2, %c0_14] : memref<4x256xf32, #tpu.memory_space<vmem>>, vector<1x256xf32>
    tpu.vector_store %arg4[%c2, %c0_14], %61 {strides = array<i32>} : memref<4x256xf32, #tpu.memory_space<vmem>>, vector<1x256xf32>,
    %c3 = arith.constant 3 : index
    %c0_15 = arith.constant 0 : index
    %68 = vector.load %arg4[%c3, %c0_15] : memref<4x256xf32, #tpu.memory_space<vmem>>, vector<1x256xf32>
    tpu.vector_store %arg4[%c3, %c0_15], %64 {strides = array<i32>} : memref<4x256xf32, #tpu.memory_space<vmem>>, vector<1x256xf32>,
    %c0_16 = arith.constant 0 : index
    %c0_17 = arith.constant 0 : index
    %69 = vector.load %arg3[%c0_16, %c0_17] : memref<8x1xi32, #tpu.memory_space<vmem>>, vector<8x1xi32>
    %c0_i32 = arith.constant 0 : i32
    %70 = vector.shape_cast %69 : vector<8x1xi32> to vector<8x1xi32>
    %71 = vector.broadcast %70 : vector<8x1xi32> to vector<8x256xi32>
    %72 = vector.broadcast %c0_i32 : i32 to vector<8x256xi32>
    %73 = arith.select %51, %71, %72 : vector<8x256xi1>, vector<8x256xi32>
    %cst_18 = arith.constant dense<0> : vector<256xi32>
    %74 = vector.multi_reduction <add>, %73, %cst_18 [0] : vector<8x256xi32> to vector<256xi32>
    %75 = vector.shape_cast %74 : vector<256xi32> to vector<1x256xi32>
    %cst_19 = arith.constant 1.000000e+08 : f32
    %76 = vector.broadcast %cst_19 : f32 to vector<1x256xf32>
    %77 = arith.cmpf oeq, %42, %76 : vector<1x256xf32>
    %c0_i32_20 = arith.constant 0 : i32
    %78 = vector.broadcast %c0_i32_20 : i32 to vector<1x256xi32>
    %79 = arith.select %77, %78, %75 : vector<1x256xi1>, vector<1x256xi32>
    %c0_21 = arith.constant 0 : index
    %c0_22 = arith.constant 0 : index
    %80 = vector.load %arg5[%c0_21, %c0_22] : memref<1x256xi32, #tpu.memory_space<vmem>>, vector<1x256xi32>
    tpu.vector_store %arg5[%c0_21, %c0_22], %79 {strides = array<i32>} : memref<1x256xi32, #tpu.memory_space<vmem>>, vector<1x256xi32>,
    %81 = arith.minimumf %55, %58 : vector<1x256xf32>
    %82 = arith.minimumf %61, %64 : vector<1x256xf32>
    %83 = arith.mulf %81, %82 : vector<1x256xf32>
    %84 = arith.maximumf %55, %58 : vector<1x256xf32>
    %85 = arith.maximumf %61, %64 : vector<1x256xf32>
    %86 = arith.mulf %84, %85 : vector<1x256xf32>
    %87 = arith.divf %83, %86 : vector<1x256xf32>
    %88 = math.sqrt %87 : vector<1x256xf32>
    %c0_23 = arith.constant 0 : index
    %c0_24 = arith.constant 0 : index
    %89 = vector.load %arg6[%c0_23, %c0_24] : memref<1x256xf32, #tpu.memory_space<vmem>>, vector<1x256xf32>
    tpu.vector_store %arg6[%c0_23, %c0_24], %88 {strides = array<i32>} : memref<1x256xf32, #tpu.memory_space<vmem>>, vector<1x256xf32>,
    return
  }
  func.func @transform_0(%arg0: i32) -> (i32, i32) {
    %c0_i32 = arith.constant 0 : i32
    %c0_i32_0 = arith.constant 0 : i32
    return %c0_i32, %arg0 : i32, i32
  }
  func.func @transform_1(%arg0: i32) -> (i32, i32) {
    %c0_i32 = arith.constant 0 : i32
    %c0_i32_0 = arith.constant 0 : i32
    %c0_i32_1 = arith.constant 0 : i32
    return %c0_i32, %c0_i32_0 : i32, i32
  }
  func.func @transform_2(%arg0: i32) -> (i32, i32) {
    %c0_i32 = arith.constant 0 : i32
    %c0_i32_0 = arith.constant 0 : i32
    %c0_i32_1 = arith.constant 0 : i32
    return %c0_i32, %c0_i32_0 : i32, i32
  }
  func.func @transform_3(%arg0: i32) -> (i32, i32) {
    %c0_i32 = arith.constant 0 : i32
    %c0_i32_0 = arith.constant 0 : i32
    return %c0_i32, %arg0 : i32, i32
  }
  func.func @transform_4(%arg0: i32) -> (i32, i32) {
    %c0_i32 = arith.constant 0 : i32
    %c0_i32_0 = arith.constant 0 : i32
    return %c0_i32, %arg0 : i32, i32
  }
  func.func @transform_5(%arg0: i32) -> (i32, i32) {
    %c0_i32 = arith.constant 0 : i32
    %c0_i32_0 = arith.constant 0 : i32
    return %c0_i32, %arg0 : i32, i32
  }
}

</mosaic_0001>

<bundles_post_ra>
// kernel: tpu_custom_call.1
= control target key start
LH: loop header
LB: loop body
LE: loop exit
PB: predicated region body
PF: predicated region fallthrough
CT: control target
= control target key end

     0   :  { %11 = vsyncpa [#allocation3], 0  ;;  %v468_v1 = vmov 2   ;;  %v469_v2 = vmov 0   ;;  %s669_s0 = inlined_call_operand.vmem [shape: f32[4,256], index: 0, kind: input, shape index: {}]   ;;  %s670_s1 = inlined_call_operand.vmem [shape: f32[8,4], index: 1, kind: input, shape index: {}]   ;;  %s671_s2 = inlined_call_operand.vmem [shape: s32[8,1], index: 2, kind: input, shape index: {}]   ;;  %s672_s3 = inlined_call_operand.hbm [shape: f32[4,256], index: 3, kind: output, shape index: {0}]   ;;  %s673_s4 = inlined_call_operand.hbm [shape: s32[1,256], index: 4, kind: output, shape index: {1}]   ;;  %s674_s5 = inlined_call_operand.hbm [shape: f32[1,256], index: 5, kind: output, shape index: {2}]  }
   0x1   :  { %v20_v0 = vld [vmem:[%s670_s1] sm:$0xff]  ;;  %380 = vset.pattern.permute.xlu1 %v468_v1  ;;  %378 = vset.pattern.permute.xlu0 %v469_v2 }
   0x2   :  { %v227_v3 = vld [vmem:[%s671_s2] sm:$0xff] }
   0x3   :  { %12 = vsyncpa [#allocation5], 0  ;;  %48 = vperm.xlu1 %380, %v20_v0   ;;  %30 = vperm.xlu0 %378, %v20_v0   ;;  %v470_v4 = vmov 3   ;;  %v471_v5 = vmov 1   ;;  %v19_v6 = vld [vmem:[%s669_s0] sm:$0xff]  ;;  %v113_v60 = vlaneseq  ;;  %s472_s0 = smov [#allocation4]  }
   0x4   :  { %382 = vset.pattern.permute.xlu2 %v469_v2  ;;  %v22_v9 = vperm.slane %v19_v6, 0  ;;  %v23_v10 = vperm.slane %v19_v6, 4  ;;  %v35_v11 = vperm.slane %v19_v6, 1  ;;  %v36_v12 = vperm.slane %v19_v6, 5  ;;  %s621_s2 = sshll.u32 %s472_s0, 4  ;;  %s342_s25 = sshll.u32 %s673_s4, 4  ;;  %s341_s2 = int_to_ptr.vmem [resolvable:$true] %s621_s2  ;;  %s343_s25 = int_to_ptr.hbm [resolvable:$true] %s342_s25 }
   0x5   :  { %229 = vperm.xlu2 %382, %v227_v3   ;;  %v79_v17 = vperm.slane %v19_v6, 2  ;;  %v80_v18 = vperm.slane %v19_v6, 6  ;;  %v87_v23 = vperm.slane %v19_v6, 3  ;;  %v88_v24 = vperm.slane %v19_v6, 7  ;;  %s473_s26 = smov [#allocation2]   ;;  %s331_s4 = sshll.u32 %s672_s3, 4  ;;  %s332_s4 = int_to_ptr.hbm [resolvable:$true] %s331_s4 }
   0x6   :  { %v26_v13 = vperm.slane %v22_v9, 0  ;;  %v27_v14 = vperm.slane %v23_v10, 0  ;;  %v39_v15 = vperm.slane %v35_v11, 1  ;;  %v40_v16 = vperm.slane %v36_v12, 1  ;;  %s329_s27 = sshll.u32 %s473_s26, 4  ;;  %s474_s3 = smov [#allocation6]   ;;  %s330_s27 = int_to_ptr.vmem [resolvable:$true] %s329_s27 }
   0x7   :  { %v83_v37 = vperm.slane %v79_v17, 2  ;;  %v84_v38 = vperm.slane %v80_v18, 2  ;;  %v91_v41 = vperm.slane %v87_v23, 3  ;;  %v92_v42 = vperm.slane %v88_v24, 3  ;;  %s351_s30 = sshll.u32 %s474_s3, 4  ;;  %s353_s8 = sshll.u32 %s674_s5, 4  ;;  %s352_s30 = int_to_ptr.vmem [resolvable:$true] %s351_s30  ;;  %s354_s8 = int_to_ptr.hbm [resolvable:$true] %s353_s8 }
   0x8   :  { %v114_v1 = vshrl.u32 %v113_v60, 7 }
   0xb   :  { %381 = vset.pattern.permute.xlu1 %v470_v4  ;;  %379 = vset.pattern.permute.xlu0 %v471_v5 }
   0xc   :  { %54 = vperm.xlu1 %381, %v20_v0   ;;  %42 = vperm.xlu0 %379, %v20_v0  }
  0x14   :  { %383 = vset.pattern.permute.xlu0 %v469_v2 }
  0x75   :  { %v49_v7 = vpop.permute.xlu1 %48  ;;  %v31_v8 = vpop.permute.xlu0 %30 }
  0x76   :  { %v514_v19 = vsub.f32 %v49_v7, %v26_v13  ;;  %v516_v20 = vsub.f32 %v49_v7, %v27_v14  ;;  %v526_v29 = vsub.f32 %v26_v13, %v31_v8  ;;  %v528_v30 = vsub.f32 %v27_v14, %v31_v8 }
  0x78   :  { %v59_v48 = vadd.f32 %v514_v19, %v526_v29  ;;  %v60_v50 = vadd.f32 %v516_v20, %v528_v30 }
  0x7e   :  { %v55_v21 = vpop.permute.xlu1 %54  ;;  %v43_v22 = vpop.permute.xlu0 %42 }
  0x7f   :  { %v518_v25 = vsub.f32 %v55_v21, %v39_v15  ;;  %v520_v26 = vsub.f32 %v55_v21, %v40_v16  ;;  %v522_v27 = vsub.f32 %v39_v15, %v43_v22  ;;  %v524_v28 = vsub.f32 %v40_v16, %v43_v22 }
  0x81   :  { %v67_v31 = vmin.f32 %v514_v19, %v518_v25  ;;  %v68_v32 = vmin.f32 %v516_v20, %v520_v26  ;;  %v73_v33 = vmax.f32 %v514_v19, %v518_v25  ;;  %v74_v34 = vmax.f32 %v516_v20, %v520_v26 }
  0x82   :  { %v65_v35 = vmin.f32 %v526_v29, %v522_v27  ;;  %v66_v36 = vmin.f32 %v528_v30, %v524_v28  ;;  %v71_v39 = vmax.f32 %v526_v29, %v522_v27  ;;  %v72_v40 = vmax.f32 %v528_v30, %v524_v28 }
  0x83   :  { %v61_v45 = vadd.f32 %v518_v25, %v522_v27  ;;  %v62_v49 = vadd.f32 %v520_v26, %v524_v28 }
  0x84   :  { %v69_v43 = vmin.f32 %v65_v35, %v67_v31  ;;  %v70_v44 = vmin.f32 %v66_v36, %v68_v32  ;;  %v75_v46 = vmax.f32 %v71_v39, %v73_v33  ;;  %v76_v47 = vmax.f32 %v72_v40, %v74_v34  ;;  %v230_v40 = vpop.permute.xlu2 %229 }
  0x85   :  { %v63_v51 = vmul.f32 %v61_v45, %v59_v48  ;;  %v64_v52 = vmul.f32 %v62_v49, %v60_v50 }
  0x86   :  { %vm77_vm0 = vcmp.gt.f32.partialorder %v69_v43, 0.0  ;;  %vm85_vm1 = vcmp.le.f32.partialorder %v83_v37, %v75_v46  ;;  %vm86_vm2 = vcmp.le.f32.partialorder %v84_v38, %v76_v47  ;;  %vm93_vm3 = vcmp.le.f32.partialorder %v75_v46, %v91_v41 }
  0x87   :  { %vm94_vm4 = vcmp.le.f32.partialorder %v76_v47, %v92_v42  ;;  %vm78_vm5 = vcmp.gt.f32.partialorder %v70_v44, 0.0  ;;  %vm95_vm6 = vmand %vm85_vm1, %vm93_vm3 }
  0x88   :  { %vm96_vm7 = vmand %vm86_vm2, %vm94_vm4  ;;  %vm198_vm4 = vcmask 1040384  }
  0x89   :  { %vm97_vm8 = vmand %vm77_vm0, %vm95_vm6 }
  0x8a   :  { %vm98_vm9 = vmand %vm78_vm5, %vm96_vm7  ;;  %v99_v53 = vsel %vm97_vm8, %v63_v51, 1e+08  ;;  %vm604_vm5 = vcmp.lt.s32.totalorder %v113_v60, 256 }
  0x8b   :  { %v100_v54 = vsel %vm98_vm9, %v64_v52, 1e+08  ;;  %v101_v55 = vrot.slane %v99_v53, 4 }
  0x8c   :  { %v107_v56 = vrot.slane %v100_v54, 4 }
  0x8d   :  { %v102_v57 = vmin.f32 %v99_v53, %v101_v55 }
  0x8e   :  { %v108_v58 = vmin.f32 %v100_v54, %v107_v56 }
  0x8f   :  { %v103_v59 = vrot.slane %v102_v57, 2 }
  0x90   :  { %v109_v61 = vrot.slane %v108_v58, 2 }
  0x91   :  { %v104_v62 = vmin.f32 %v102_v57, %v103_v59 }
  0x92   :  { %v110_v63 = vmin.f32 %v108_v58, %v109_v61 }
  0x93   :  { %v105_v0 = vrot.slane %v104_v62, 1 }
  0x94   :  { %v111_v2 = vrot.slane %v110_v63, 1 }
  0x95   :  { %v555_v3 = vmin.f32 %v104_v62, %v105_v0 }
  0x96   :  { %v557_v4 = vmin.f32 %v110_v63, %v111_v2 }
  0x97   :  { %vm115_vm10 = vcmp.eq.f32.partialorder %v99_v53, %v555_v3  ;;  %vm245_vm7 = vcmp.eq.f32.partialorder %v555_v3, 1e+08 }
  0x98   :  { %vm116_vm11 = vcmp.eq.f32.partialorder %v100_v54, %v557_v4  ;;  %v117_v5 = vsel %vm115_vm10, %v114_v1, 8  ;;  %vm246_vm6 = vcmp.eq.f32.partialorder %v557_v4, 1e+08 }
  0x99   :  { %v118_v6 = vsel %vm116_vm11, %v114_v1, 8  ;;  %v119_v7 = vrot.slane %v117_v5, 4 }
  0x9a   :  { %v128_v8 = vrot.slane %v118_v6, 4 }
  0x9b   :  { %vm120_vm12 = vcmp.lt.s32.totalorder %v117_v5, %v119_v7 }
  0x9c   :  { %v121_v9 = vsel %vm120_vm12, %v117_v5, %v119_v7  ;;  %vm129_vm13 = vcmp.lt.s32.totalorder %v118_v6, %v128_v8 }
  0x9d   :  { %v122_v10 = vrot.slane %v121_v9, 2  ;;  %v130_v11 = vsel %vm129_vm13, %v118_v6, %v128_v8 }
  0x9e   :  { %v131_v12 = vrot.slane %v130_v11, 2 }
  0x9f   :  { %vm123_vm14 = vcmp.lt.s32.totalorder %v121_v9, %v122_v10 }
  0xa0   :  { %v124_v13 = vsel %vm123_vm14, %v121_v9, %v122_v10  ;;  %vm132_vm15 = vcmp.lt.s32.totalorder %v130_v11, %v131_v12 }
  0xa1   :  { %v125_v14 = vrot.slane %v124_v13, 1  ;;  %v133_v15 = vsel %vm132_vm15, %v130_v11, %v131_v12 }
  0xa2   :  { %v134_v16 = vrot.slane %v133_v15, 1 }
  0xa3   :  { %vm126_vm0 = vcmp.lt.s32.totalorder %v124_v13, %v125_v14 }
  0xa4   :  { %v127_v17 = vsel %vm126_vm0, %v124_v13, %v125_v14  ;;  %vm135_vm1 = vcmp.lt.s32.totalorder %v133_v15, %v134_v16 }
  0xa5   :  { %v136_v18 = vsel %vm135_vm1, %v133_v15, %v134_v16  ;;  %vm561_vm2 = vcmp.eq.s32.totalorder %v114_v1, %v127_v17 }
  0xa6   :  { %vm565_vm3 = vcmp.eq.s32.totalorder %v114_v1, %v136_v18  ;;  %v139_v23 = vsel %vm561_vm2, %v526_v29, 0.0  ;;  %v153_v24 = vsel %vm561_vm2, %v522_v27, 0.0  ;;  %v167_v31 = vsel %vm561_vm2, %v514_v19, 0.0 }
  0xa7   :  { %v140_v32 = vsel %vm565_vm3, %v528_v30, 0.0  ;;  %v141_v33 = vrot.slane %v139_v23, 4  ;;  %v154_v34 = vsel %vm565_vm3, %v524_v28, 0.0  ;;  %v155_v35 = vrot.slane %v153_v24, 4 }
  0xa8   :  { %v147_v36 = vrot.slane %v140_v32, 4  ;;  %v161_v29 = vrot.slane %v154_v34, 4  ;;  %v168_v27 = vsel %vm565_vm3, %v516_v20, 0.0  ;;  %v169_v37 = vrot.slane %v167_v31, 4 }
  0xa9   :  { %v142_v38 = vadd.f32 %v141_v33, %v139_v23  ;;  %v156_v39 = vadd.f32 %v155_v35, %v153_v24  ;;  %v175_v19 = vrot.slane %v168_v27, 4  ;;  %v181_v30 = vsel %vm561_vm2, %v518_v25, 0.0 }
  0xaa   :  { %v148_v41 = vadd.f32 %v147_v36, %v140_v32  ;;  %v162_v42 = vadd.f32 %v161_v29, %v154_v34  ;;  %v170_v43 = vadd.f32 %v169_v37, %v167_v31  ;;  %v182_v28 = vsel %vm565_vm3, %v520_v26, 0.0 }
  0xab   :  { %v143_v44 = vrot.slane %v142_v38, 2  ;;  %v157_v45 = vrot.slane %v156_v39, 2  ;;  %v176_v46 = vadd.f32 %v175_v19, %v168_v27  ;;  %v183_v20 = vrot.slane %v181_v30, 4 }
  0xac   :  { %v149_v47 = vrot.slane %v148_v41, 2  ;;  %v163_v48 = vrot.slane %v162_v42, 2  ;;  %v171_v49 = vrot.slane %v170_v43, 2  ;;  %v189_v50 = vrot.slane %v182_v28, 4 }
  0xad   :  { %v177_v51 = vrot.slane %v176_v46, 2  ;;  %v184_v52 = vadd.f32 %v183_v20, %v181_v30  ;;  %v231_v25 = vsel %vm561_vm2, %v230_v40, 0  ;;  %v232_v53 = vsel %vm565_vm3, %v230_v40, 0 }
  0xae   :  { %v150_v54 = vadd.f32 %v149_v47, %v148_v41  ;;  %v164_v55 = vadd.f32 %v163_v48, %v162_v42  ;;  %v190_v26 = vadd.f32 %v189_v50, %v182_v28  ;;  %v233_v56 = vrot.slane %v231_v25, 4 }
  0xaf   :  { %v178_v57 = vadd.f32 %v177_v51, %v176_v46  ;;  %v185_v58 = vrot.slane %v184_v52, 2  ;;  %v239_v59 = vrot.slane %v232_v53, 4  ;;  %v144_v61 = vadd.f32 %v143_v44, %v142_v38 }
  0xb0   :  { %v151_v62 = vrot.slane %v150_v54, 1  ;;  %v165_v63 = vrot.slane %v164_v55, 1  ;;  %v191_v0 = vrot.slane %v190_v26, 2  ;;  %v234_v1 = vadd.s32 %v233_v56, %v231_v25 }
  0xb1   :  { %v179_v2 = vrot.slane %v178_v57, 1  ;;  %v240_v5 = vadd.s32 %v239_v59, %v232_v53  ;;  %v145_v6 = vrot.slane %v144_v61, 1  ;;  %v158_v7 = vadd.f32 %v157_v45, %v156_v39 }
  0xb2   :  { %v597_v8 = vadd.f32 %v151_v62, %v150_v54  ;;  %v599_v9 = vadd.f32 %v165_v63, %v164_v55  ;;  %v192_v10 = vadd.f32 %v191_v0, %v190_v26  ;;  %v235_v11 = vrot.slane %v234_v1, 2 }
  0xb3   :  { %v601_v12 = vadd.f32 %v179_v2, %v178_v57  ;;  %v241_v13 = vrot.slane %v240_v5, 2  ;;  %v159_v15 = vrot.slane %v158_v7, 1  ;;  %v610_v21 = vadd.f32 %v145_v6, %v144_v61 }
  0xb4   :  { %v193_v16 = vrot.slane %v192_v10, 1  ;;  %v236_v17 = vadd.s32 %v235_v11, %v234_v1  ;;  %v259_v18 = vmax.f32 %v597_v8, %v599_v9  ;;  %v172_v24 = vadd.f32 %v171_v49, %v170_v43 }
  0xb5   :  { %v242_v22 = vadd.s32 %v241_v13, %v240_v5  ;;  %v612_v23 = vadd.f32 %v159_v15, %v158_v7  ;;  %v186_v31 = vadd.f32 %v185_v58, %v184_v52  ;;  %v197_v60 = vrot.slane %v597_v8, 7 }
  0xb6   :  { %v614_v32 = vadd.f32 %v193_v16, %v192_v10  ;;  %v237_v33 = vrot.slane %v236_v17, 1  ;;  %v208_v34 = vrot.slane %v599_v9, 7  ;;  %v173_v36 = vrot.slane %v172_v24, 1 }
  0xb7   :  { %v243_v35 = vrot.slane %v242_v22, 1  ;;  %v187_v29 = vrot.slane %v186_v31, 1  ;;  %v215_v27 = vrot.slane %v601_v12, 7  ;;  %v199_v38 = vsel %vm198_vm4, %v610_v21, %v197_v60 }
  0xb8   :  { %v261_v37 = vmax.f32 %v601_v12, %v614_v32  ;;  %v238_v39 = vadd.s32 %v237_v33, %v236_v17  ;;  %v628_v30 = vadd.f32 %v173_v36, %v172_v24  ;;  %205 = vst.msk [vmem:[#allocation2] ss:$4 sm:$0x3] %vm604_vm5, %v199_v38  ;;  %v209_v40 = vsel %vm198_vm4, %v612_v23, %v208_v34 }
  0xb9   :  { %v244_v19 = vadd.s32 %v243_v35, %v242_v22  ;;  %v188_v42 = vadd.f32 %v187_v29, %v186_v31  ;;  %212 = vst.msk [vmem:[#allocation2 + $0x1] ss:$4 sm:$0x3] %vm604_vm5, %v209_v40  ;;  %v222_v43 = vrot.slane %v614_v32, 7  ;;  %v258_v20 = vmax.f32 %v610_v21, %v612_v23 }
  0xba   :  { %v263_v41 = vmul.f32 %v261_v37, %v259_v18  ;;  %v216_v44 = vsel %vm198_vm4, %v628_v30, %v215_v27  ;;  %v247_v4 = vsel %vm245_vm7, 0, %v238_v39  ;;  %v253_v52 = vmin.f32 %v597_v8, %v599_v9 }
  0xbb   :  { %v248_v28 = vsel %vm246_vm6, 0, %v244_v19  ;;  %219 = vst.msk [vmem:[#allocation2 + $0x2] ss:$4 sm:$0x3] %vm604_vm5, %v216_v44  ;;  %v223_v46 = vsel %vm198_vm4, %v188_v42, %v222_v43  ;;  %v260_v3 = vmax.f32 %v628_v30, %v188_v42  ;;  %v255_v53 = vmin.f32 %v601_v12, %v614_v32 }
  0xbc   :  { %v249_v45 = vrot.slane %v248_v28, 7  ;;  %384 = vrcp.f32 %v263_v41  ;;  %226 = vst.msk [vmem:[#allocation2 + $0x3] ss:$4 sm:$0x3] %vm604_vm5, %v223_v46  ;;  %v290_v25 = vand.u32 2147483648, %v263_v41  ;;  %vm284_vm9 = vweird.f32 %v263_v41 }
  0xbd   :  { %334 = dma.vmem_to_hbm [thread:$0]  %s330_s27, 128, %s332_s4, [#allocation3]   ;;  %v262_v48 = vmul.f32 %v260_v3, %v258_v20  ;;  %v288_v55 = vand.u32 2147483647, %v263_v41  ;;  %v257_v59 = vmul.f32 %v255_v53, %v253_v52  ;;  %v252_v0 = vmin.f32 %v610_v21, %v612_v23 }
  0xbe   :  { %v250_v47 = vsel %vm198_vm4, %v247_v4, %v249_v45  ;;  %v291_v58 = vor.u32 1.1754944e-38, %v290_v25  ;;  %v254_v1 = vmin.f32 %v628_v30, %v188_v42 }
  0xbf   :  { %251 = vst.msk [vmem:[#allocation4] sm:$0x3] %vm604_vm5, %v250_v47  ;;  %386 = vrcp.f32 %v262_v48  ;;  %vm289_vm11 = vcmp.eq.f32.partialorder %v288_v55, 8.507059e+37  ;;  %v275_v2 = vand.u32 2147483648, %v262_v48  ;;  %v273_v7 = vand.u32 2147483647, %v262_v48 }
  0xc0   :  { %345 = dma.vmem_to_hbm [thread:$0]  %s341_s2, 32, %s343_s25, [#allocation5]   ;;  %vm269_vm13 = vweird.f32 %v262_v48  ;;  %v256_v10 = vmul.f32 %v254_v1, %v252_v0 }
  0xc1   :  { %v276_v9 = vor.u32 1.1754944e-38, %v275_v2  ;;  %vm274_vm15 = vcmp.eq.f32.partialorder %v273_v7, 8.507059e+37 }
  0xc2   :  { %v385_v49 = vpop.eup %384 }
  0xc3   :  { %v280_v50 = vmul.f32 %v385_v49, %v263_v41  ;;  %vm285_vm8 = vweird.f32 %v385_v49 }
  0xc4   :  { %vm286_vm10 = vmor %vm284_vm9, %vm285_vm8 }
  0xc5   :  { %v281_v51 = vsub.f32 1.0, %v280_v50  ;;  %v387_v26 = vpop.eup %386 }
  0xc6   :  { %v265_v57 = vmul.f32 %v387_v26, %v262_v48  ;;  %vm270_vm12 = vweird.f32 %v387_v26 }
  0xc7   :  { %v282_v54 = vmul.f32 %v385_v49, %v281_v51  ;;  %vm271_vm14 = vmor %vm269_vm13, %vm270_vm12 }
  0xc8   :  { %v266_v62 = vsub.f32 1.0, %v265_v57 }
  0xc9   :  { %v283_v56 = vadd.f32 %v385_v49, %v282_v54 }
  0xca   :  { %v267_v6 = vmul.f32 %v387_v26, %v266_v62 }
  0xcb   :  { %v287_v61 = vsel %vm286_vm10, %v385_v49, %v283_v56 }
  0xcc   :  { %v292_v63 = vsel %vm289_vm11, %v291_v58, %v287_v61  ;;  %v268_v8 = vadd.f32 %v387_v26, %v267_v6 }
  0xcd   :  { %v293_v5 = vmul.f32 %v292_v63, %v257_v59 }
  0xce   :  { %v272_v11 = vsel %vm271_vm14, %v387_v26, %v268_v8 }
  0xcf   :  { %388 = vrsqrt.f32 %v293_v5  ;;  %v277_v12 = vsel %vm274_vm15, %v276_v9, %v272_v11  ;;  %vm313_vm0 = vcmp.eq.f32.partialorder %v293_v5, inf  ;;  %v316_v60 = vand.u32 2147483648, %v293_v5 }
  0xd0   :  { %v278_v13 = vmul.f32 %v277_v12, %v256_v10  ;;  %vm315_vm1 = vcmp.eq.f32.partialorder %v293_v5, 0.0 }
  0xd2   :  { %390 = vrsqrt.f32 %v278_v13  ;;  %vm301_vm2 = vcmp.eq.f32.partialorder %v278_v13, inf  ;;  %v304_v38 = vand.u32 2147483648, %v278_v13  ;;  %vm303_vm3 = vcmp.eq.f32.partialorder %v278_v13, 0.0 }
  0xd5   :  { %v389_v15 = vpop.eup %388 }
  0xd6   :  { %v307_v16 = vmul.f32 %v389_v15, %v293_v5 }
  0xd8   :  { %v308_v17 = vmul.f32 %v389_v15, %v307_v16  ;;  %v391_v21 = vpop.eup %390 }
  0xd9   :  { %v295_v22 = vmul.f32 %v391_v21, %v278_v13 }
  0xda   :  { %v309_v18 = vmul.f32 0.5, %v308_v17 }
  0xdb   :  { %v296_v24 = vmul.f32 %v391_v21, %v295_v22 }
  0xdc   :  { %v310_v23 = vsub.f32 1.5, %v309_v18 }
  0xdd   :  { %v297_v32 = vmul.f32 0.5, %v296_v24 }
  0xde   :  { %v311_v31 = vmul.f32 %v389_v15, %v310_v23 }
  0xdf   :  { %v298_v34 = vsub.f32 1.5, %v297_v32 }
  0xe0   :  { %v312_v33 = vmul.f32 %v311_v31, %v293_v5 }
  0xe1   :  { %v299_v29 = vmul.f32 %v391_v21, %v298_v34 }
  0xe2   :  { %v314_v35 = vsel %vm313_vm0, %v293_v5, %v312_v33 }
  0xe3   :  { %v317_v36 = vsel %vm315_vm1, %v316_v60, %v314_v35  ;;  %v300_v27 = vmul.f32 %v299_v29, %v278_v13 }
  0xe4   :  { %v320_v37 = vrot.slane %v317_v36, 7 }
  0xe5   :  { %v302_v39 = vsel %vm301_vm2, %v278_v13, %v300_v27 }
  0xe6   :  { %v305_v19 = vsel %vm303_vm3, %v304_v38, %v302_v39 }
  0xe7   :  { %v321_v30 = vsel %vm198_vm4, %v305_v19, %v320_v37 }
  0xe8   :  { %323 = vst.msk [vmem:[#allocation6] sm:$0x3] %vm604_vm5, %v321_v30 }
  0xe9   :  { %356 = dma.vmem_to_hbm [thread:$0]  %s352_s30, 32, %s354_s8, [#allocation5]  }
  0xea   :  { %464 = dma.done.wait [#allocation3], 128  }
  0xeb   :  { %465 = vsyncadd [#allocation3], 4294967168 }
  0xec   :  { %466 = dma.done.wait [#allocation5], 64  }
  0xed   :  { %467 = vsyncadd [#allocation5], 4294967232 }
  0xee   :  { %369 = vsyncpa [#allocation3], 1 }
  0xef   :  { %370 = vsyncpa [#allocation5], 1 }

</bundles_post_ra>
